<compile_context>
chip_gen: v7x
topology: tpu7x:2x2x1
jax: 0.10.0
libtpu: 0.0.40
codegen_flags: <defaults>
</compile_context>

<pallas_src>
import functools

import jax
import jax.numpy as jnp
from jax.experimental import pallas as pl
from jax.experimental.pallas import tpu as pltpu


def _full_spec(shape):
    nd = len(shape)
    return pl.BlockSpec(shape, lambda i, nd=nd: (0,) * nd)


def _row_blocking(n_rows, max_block=512):
    """Pick a row-tile size: full block for small inputs, 512-row tiles otherwise."""
    if n_rows <= max_block:
        return n_rows, n_rows
    block = max_block
    padded = ((n_rows + block - 1) // block) * block
    return block, padded


# ----------------------------------------------------------------------------
# 1) Fused distance / switch-score kernel (whole time range in one step).
# ----------------------------------------------------------------------------
def _dist_score_kernel(state_ref, g_ref, summat_ref, negmask_ref, score_ref,
                       *, obs_len, pred_len, scale, eps):
    # Signed one-hot gather: diff[t*D+d, leaf] =
    #   human_loc[t, d, center(leaf)] - obj_loc[t, d, obj(leaf)]
    # (0.001 preprocess scale folded in here.)
    diff = jnp.dot(state_ref[...] * scale, g_ref[...],
                   preferred_element_type=jnp.float32)            # (obs*D, n_leaf)
    # Sum of squares over the coordinate axis for every timestep at once
    # (block-ones contraction keeps everything 2-D; one MXU pass per call, not per step).
    dsq = jnp.dot(summat_ref[...], diff * diff,
                  preferred_element_type=jnp.float32)             # (obs, n_leaf)
    # Per-human min over that human's leaves (other leaves masked with +1e9).
    masked = dsq[None, :, :] + negmask_ref[...][:, None, :]       # (n_h, obs, n_leaf)
    dmin = jnp.sqrt(jnp.min(masked, axis=-1))                     # (n_h, obs)  == min distance
    score_obs = 0.5 + 1.0 / (dmin + eps)                          # exact divide (tiny array)
    # Single lane-dense flush: time on lanes.
    score_ref[:, :obs_len] = score_obs
    if pred_len > 1:
        # Rollout predict() is an identity stub, so every rollout step re-emits the
        # last observed state -> scores repeat the last observed column.
        last = score_obs[:, obs_len - 1:obs_len]
        score_ref[:, obs_len:] = jnp.broadcast_to(
            last, (score_obs.shape[0], pred_len - 1))


def fused_distance_scores(state_flat, g_signed, summat, negmask,
                          *, obs_len, pred_len, scale):
    n_h = negmask.shape[0]
    t_total = obs_len + pred_len - 1
    kernel = functools.partial(_dist_score_kernel, obs_len=obs_len,
                               pred_len=pred_len, scale=scale, eps=1e-4)
    return pl.pallas_call(
        kernel,
        out_shape=jax.ShapeDtypeStruct((n_h, t_total), jnp.float32),
        grid=(1,),
        in_specs=[_full_spec(state_flat.shape), _full_spec(g_signed.shape),
                  _full_spec(summat.shape), _full_spec(negmask.shape)],
        out_specs=_full_spec((n_h, t_total)),
        compiler_params=pltpu.CompilerParams(dimension_semantics=("arbitrary",)),
    )(state_flat, g_signed, summat, negmask)


# ----------------------------------------------------------------------------
# 2) Embedding kernels.
# ----------------------------------------------------------------------------
def _type_part_kernel(type_ref, wt_ref, bt_ref, wot_ref, boi_ref, out_ref):
    # time-invariant half of obj_inp_embedding: relu(type @ Wt + bt) @ Wot + b_oi
    te = jnp.maximum(
        jnp.dot(type_ref[...], wt_ref[...], preferred_element_type=jnp.float32)
        + bt_ref[...], 0.0)
    out_ref[...] = (jnp.dot(te, wot_ref[...], preferred_element_type=jnp.float32)
                    + boi_ref[...])


def type_part_embed(obj_type, w_type, b_type, w_oi_type, b_oi):
    n_obj = obj_type.shape[0]
    h = w_type.shape[1]
    args = (obj_type, w_type, b_type.reshape(1, h), w_oi_type, b_oi.reshape(1, h))
    return pl.pallas_call(
        _type_part_kernel,
        out_shape=jax.ShapeDtypeStruct((n_obj, h), jnp.float32),
        grid=(1,),
        in_specs=[_full_spec(a.shape) for a in args],
        out_specs=_full_spec((n_obj, h)),
    )(*args)


def _loc_mlp_kernel(x_ref, w_ref, b_ref, o_ref, *, scale):
    o_ref[...] = jnp.maximum(
        jnp.dot(x_ref[...] * scale, w_ref[...], preferred_element_type=jnp.float32)
        + b_ref[...], 0.0)


def row_tiled_loc_mlp(x, w, b, *, scale, max_block_rows=512):
    n_rows, d = x.shape
    h = w.shape[1]
    block, padded = _row_blocking(n_rows, max_block_rows)
    if padded != n_rows:
        x = jnp.pad(x, ((0, padded - n_rows), (0, 0)))
    out = pl.pallas_call(
        functools.partial(_loc_mlp_kernel, scale=scale),
        out_shape=jax.ShapeDtypeStruct((padded, h), jnp.float32),
        grid=(padded // block,),
        in_specs=[pl.BlockSpec((block, d), lambda i: (i, 0)),
                  pl.BlockSpec((d, h), lambda i: (0, 0)),
                  pl.BlockSpec((1, h), lambda i: (0, 0))],
        out_specs=pl.BlockSpec((block, h), lambda i: (i, 0)),
        compiler_params=pltpu.CompilerParams(
            dimension_semantics=("parallel",),
            vmem_limit_bytes=32 * 1024 * 1024),
    )(x, w, b.reshape(1, h))
    return out[:n_rows]


def _obj_embed_kernel(x_ref, tp_ref, wl_ref, bl_ref, wol_ref, o_ref, *, scale):
    # obj_loc_embedding then obj_inp_embedding (loc half); type half arrives
    # pre-computed per row (broadcast over time), no one-hot matmul.
    loc = jnp.maximum(
        jnp.dot(x_ref[...] * scale, wl_ref[...], preferred_element_type=jnp.float32)
        + bl_ref[...], 0.0)
    o_ref[...] = jnp.maximum(
        jnp.dot(loc, wol_ref[...], preferred_element_type=jnp.float32) + tp_ref[...],
        0.0)


def row_tiled_obj_embed(x, type_rows, w_loc, b_loc, w_oi_loc, *, scale,
                        max_block_rows=512):
    n_rows, d = x.shape
    h = w_loc.shape[1]
    block, padded = _row_blocking(n_rows, max_block_rows)
    if padded != n_rows:
        pad = ((0, padded - n_rows), (0, 0))
        x = jnp.pad(x, pad)
        type_rows = jnp.pad(type_rows, pad)
    out = pl.pallas_call(
        functools.partial(_obj_embed_kernel, scale=scale),
        out_shape=jax.ShapeDtypeStruct((padded, h), jnp.float32),
        grid=(padded // block,),
        in_specs=[pl.BlockSpec((block, d), lambda i: (i, 0)),
                  pl.BlockSpec((block, h), lambda i: (i, 0)),
                  pl.BlockSpec((d, h), lambda i: (0, 0)),
                  pl.BlockSpec((1, h), lambda i: (0, 0)),
                  pl.BlockSpec((h, h), lambda i: (0, 0))],
        out_specs=pl.BlockSpec((block, h), lambda i: (i, 0)),
        compiler_params=pltpu.CompilerParams(
            dimension_semantics=("parallel",),
            vmem_limit_bytes=32 * 1024 * 1024),
    )(x, type_rows, w_loc, b_loc.reshape(1, h), w_oi_loc)
    return out[:n_rows]


# ----------------------------------------------------------------------------
# Model wrapper (parameters + glue in plain JAX; hot paths in the kernels above)
# ----------------------------------------------------------------------------
class PerTranPallas:
    def __init__(self, key, human_input_size, obj_input_size, hidden_size, num_obj_types):
        ks = jax.random.split(key, 5)
        s = 0.1
        f32 = jnp.float32
        self.hidden_size = hidden_size
        self.params = dict(
            w_human=(jax.random.normal(ks[0], (human_input_size, hidden_size)) * s).astype(f32),
            b_human=jnp.zeros((hidden_size,), f32),
            w_objloc=(jax.random.normal(ks[1], (obj_input_size, hidden_size)) * s).astype(f32),
            b_objloc=jnp.zeros((hidden_size,), f32),
            w_type=(jax.random.normal(ks[2], (num_obj_types, hidden_size)) * s).astype(f32),
            b_type=jnp.zeros((hidden_size,), f32),
            # obj_inp_embedding over concat([type_emb, loc_emb]) == split matmul
            w_oi_type=(jax.random.normal(ks[3], (hidden_size, hidden_size)) * s).astype(f32),
            w_oi_loc=(jax.random.normal(ks[4], (hidden_size, hidden_size)) * s).astype(f32),
            b_oi=jnp.zeros((hidden_size,), f32),
        )

    def forward(self, human_x, human_y, obj_x, obj_y, obj_type,
                leaf_center_idx, leaf_obj_idx, pred_len, is_training=False):
        scale, inv_scale = 0.001, 1000.0
        n_h, obs_len, d = human_x.shape
        n_obj = obj_x.shape[0]
        t_total = obs_len + pred_len - 1

        human_x = human_x.astype(jnp.float32)
        obj_x = obj_x.astype(jnp.float32)

        # preprocess scaling of the targets (x-scaling is folded into the kernels)
        hy = human_y.astype(jnp.float32) * scale
        oy = obj_y.astype(jnp.float32) * scale

        # graph structure, built once: signed one-hot gather + per-human min mask
        gcT = (leaf_center_idx[None, :] == jnp.arange(n_h)[:, None]).astype(jnp.float32)
        goT = (leaf_obj_idx[None, :] == jnp.arange(n_obj)[:, None]).astype(jnp.float32)
        g_signed = jnp.concatenate([gcT, -goT], axis=0)            # (n_h+n_obj, n_leaf)
        negmask = jnp.where(gcT > 0, 0.0, 1e9).astype(jnp.float32)

        # batched "current_persistent_loc" for every observed step (time-major rows)
        loc_all = jnp.concatenate([human_x, obj_x], axis=0)        # (n_nodes, obs, D)
        state_flat = jnp.transpose(loc_all, (1, 2, 0)).reshape(obs_len * d, n_h + n_obj)
        summat = jnp.kron(jnp.eye(obs_len, dtype=jnp.float32),
                          jnp.ones((1, d), jnp.float32))           # (obs, obs*D)

        dist_score = fused_distance_scores(
            state_flat, g_signed, summat, negmask,
            obs_len=obs_len, pred_len=pred_len, scale=scale)       # (n_h, t_total)

        # predict(): "manual all-transient" selects the transient branch; the real
        # transient / persistent predictors are external sub-modules, so predict()
        # is an identity -> every rollout step re-emits the last observed location.
        # TODO(synk): plug real transient/persistent predict here (would need a
        # short sequential rollout loop carrying state).
        y_pred_human = jnp.broadcast_to(
            human_x[:, obs_len - 1:obs_len, :] * scale, (n_h, pred_len, d))
        y_pred_obj = jnp.broadcast_to(
            obj_x[:, obs_len - 1:obs_len, :] * scale, (n_obj, pred_len, obj_x.shape[2]))

        # node embeddings for all observation timesteps
        type_part = type_part_embed(
            obj_type.astype(jnp.float32),
            self.params["w_type"], self.params["b_type"],
            self.params["w_oi_type"], self.params["b_oi"])          # (n_obj, hidden)
        type_rows = jnp.repeat(type_part, obs_len, axis=0)          # pure broadcast, no matmul
        hx_flat = human_x.reshape(n_h * obs_len, d)
        ox_flat = obj_x.reshape(n_obj * obs_len, obj_x.shape[2])
        h_emb = row_tiled_loc_mlp(hx_flat, self.params["w_human"],
                                  self.params["b_human"], scale=scale)
        o_emb = row_tiled_obj_embed(ox_flat, type_rows, self.params["w_objloc"],
                                    self.params["b_objloc"], self.params["w_oi_loc"],
                                    scale=scale)
        h_emb = h_emb.reshape(n_h, obs_len, self.hidden_size)
        o_emb = o_emb.reshape(n_obj, obs_len, self.hidden_size)

        # postprocess (inference path): unscale by 1000 (plain jnp, XLA-fused)
        if not is_training:
            y_human, y_obj = hy * inv_scale, oy * inv_scale
            y_pred_human = y_pred_human * inv_scale
            y_pred_obj = y_pred_obj * inv_scale
        else:
            y_human, y_obj = hy, oy

        additional_output = {
            "pred_distance_score": dist_score,
            # all-transient branch: switch score/label are identically one
            "pred_switch_score": jnp.ones((n_h, t_total), jnp.float32),
            "pred_switch_label": jnp.ones((n_h, t_total), jnp.float32),
            "human_embed_feat": h_emb,
            "obj_embed_feat": o_emb,
            # TODO(synk): gt_switch_label/score, distance_beta, transient_is_aware /
            # transient_is_inter come from graph data / external sub-modules.
        }
        return (y_human, y_obj), (y_pred_human, y_pred_obj), additional_output


# ----------------------------------------------------------------------------
if __name__ == "__main__":
    key = jax.random.PRNGKey(0)
    n_human = 2
    n_obj_per_human = 4
    n_obj = n_human * n_obj_per_human
    human_input_size = obj_input_size = 4
    hidden_size = 32
    num_obj_types = 8
    obs_len, pred_len = 3, 4
    t_total = obs_len + pred_len - 1

    ks = jax.random.split(key, 6)
    human_x = jax.random.normal(ks[0], (n_human, obs_len, human_input_size), jnp.float32) * 100.0
    human_y = jax.random.normal(ks[1], (n_human, pred_len, human_input_size), jnp.float32) * 100.0
    obj_x = jax.random.normal(ks[2], (n_obj, obs_len, obj_input_size), jnp.float32) * 100.0
    obj_y = jax.random.normal(ks[3], (n_obj, pred_len, obj_input_size), jnp.float32) * 100.0
    obj_type = jax.nn.one_hot(jnp.arange(n_obj) % num_obj_types, num_obj_types, dtype=jnp.float32)
    leaf_center_idx = jnp.repeat(jnp.arange(n_human), n_obj_per_human)  # leaf -> human
    leaf_obj_idx = jnp.arange(n_obj)                                    # leaf -> obj

    model = PerTranPallas(ks[4], human_input_size, obj_input_size, hidden_size, num_obj_types)
    out = model.forward(human_x, human_y, obj_x, obj_y, obj_type,
                        leaf_center_idx, leaf_obj_idx, pred_len, is_training=False)
    jax.block_until_ready(out)

    (y_h, y_o), (yp_h, yp_o), add = out

    # pure-jnp reference of the distance scores (observation phase + identity rollout)
    hx_s = human_x * 0.001
    ox_s = obj_x * 0.001
    hl = hx_s[leaf_center_idx]                   # (n_leaf, obs, D)
    ol = ox_s[leaf_obj_idx]
    d_ref = jnp.sqrt(jnp.sum((hl - ol) ** 2, -1))                    # (n_leaf, obs)
    dmin_ref = jnp.min(d_ref.reshape(n_human, n_obj_per_human, obs_len), axis=1)
    score_ref = 0.5 + 1.0 / (dmin_ref + 1e-4)                        # (n_h, obs)
    got = add["pred_distance_score"]
    assert got.shape == (n_human, t_total)
    assert jnp.allclose(got[:, :obs_len], score_ref, rtol=2e-2, atol=1e-3), (got, score_ref)
    assert jnp.allclose(got[:, obs_len:],
                        jnp.broadcast_to(score_ref[:, -1:], (n_human, pred_len - 1)),
                        rtol=2e-2, atol=1e-3)

    # pure-jnp reference of the obj embedding (validates the type broadcast path)
    p = model.params
    hi = jax.lax.Precision.HIGHEST
    relu = lambda x: jnp.maximum(x, 0.0)
    te = relu(jnp.dot(obj_type, p["w_type"], precision=hi) + p["b_type"])
    le = relu(jnp.dot(obj_x.reshape(-1, obj_input_size) * 0.001, p["w_objloc"],
                      precision=hi) + p["b_objloc"])
    tp = jnp.dot(te, p["w_oi_type"], precision=hi) + p["b_oi"]
    oemb_ref = relu(jnp.dot(le, p["w_oi_loc"], precision=hi)
                    + jnp.repeat(tp, obs_len, axis=0)).reshape(n_obj, obs_len, hidden_size)
    assert jnp.allclose(add["obj_embed_feat"], oemb_ref, rtol=2e-2, atol=1e-3)

    assert yp_h.shape == (n_human, pred_len, human_input_size)
    assert yp_o.shape == (n_obj, pred_len, obj_input_size)
    assert add["human_embed_feat"].shape == (n_human, obs_len, hidden_size)
    print("KERNEL_OK")
</pallas_src>

<mosaic_0001>
module attributes {stable_mosaic.version = 11 : i64} {
  func.func @_dist_score_kernel(%arg0: i32, %arg1: memref<12x10xf32, #tpu.memory_space<vmem>>, %arg2: memref<10x8xf32, #tpu.memory_space<vmem>>, %arg3: memref<3x12xf32, #tpu.memory_space<vmem>>, %arg4: memref<2x8xf32, #tpu.memory_space<vmem>>, %arg5: memref<2x6xf32, #tpu.memory_space<vmem>>) attributes {dimension_semantics = [#tpu.dimension_semantics<arbitrary>], iteration_bounds = array<i64: 1>, scalar_prefetch = 0 : i64, scratch_operands = 0 : i64, tpu.core_type = #tpu.core_type<tc>, window_params = [{pipeline_mode = #tpu.pipeline_mode<synchronous>, transform_indices = @transform_0, window_bounds = array<i64: 12, 10>}, {pipeline_mode = #tpu.pipeline_mode<synchronous>, transform_indices = @transform_1, window_bounds = array<i64: 10, 8>}, {pipeline_mode = #tpu.pipeline_mode<synchronous>, transform_indices = @transform_2, window_bounds = array<i64: 3, 12>}, {pipeline_mode = #tpu.pipeline_mode<synchronous>, transform_indices = @transform_3, window_bounds = array<i64: 2, 8>}, {pipeline_mode = #tpu.pipeline_mode<synchronous>, transform_indices = @transform_4, window_bounds = array<i64: 2, 6>}]} {
    %c0 = arith.constant 0 : index
    %c0_0 = arith.constant 0 : index
    %0 = vector.load %arg1[%c0, %c0_0] : memref<12x10xf32, #tpu.memory_space<vmem>>, vector<12x10xf32>
    %cst = arith.constant 1.000000e-03 : f32
    %1 = vector.broadcast %cst : f32 to vector<12x10xf32>
    %2 = arith.mulf %0, %1 : vector<12x10xf32>
    %c0_1 = arith.constant 0 : index
    %c0_2 = arith.constant 0 : index
    %3 = vector.load %arg2[%c0_1, %c0_2] : memref<10x8xf32, #tpu.memory_space<vmem>>, vector<10x8xf32>
    %cst_3 = arith.constant dense<0.000000e+00> : vector<12x8xf32>
    %4 = tpu.matmul %2, %3, %cst_3 {dimension_numbers = #tpu.dot_dimension_numbers<[1], [0], [0], [1], [0, 0, 1, 1], [], []>} : vector<12x10xf32>, vector<10x8xf32>, vector<12x8xf32> -> vector<12x8xf32>
    %c0_4 = arith.constant 0 : index
    %c0_5 = arith.constant 0 : index
    %5 = vector.load %arg3[%c0_4, %c0_5] : memref<3x12xf32, #tpu.memory_space<vmem>>, vector<3x12xf32>
    %6 = arith.mulf %4, %4 : vector<12x8xf32>
    %cst_6 = arith.constant dense<0.000000e+00> : vector<3x8xf32>
    %7 = tpu.matmul %5, %6, %cst_6 {dimension_numbers = #tpu.dot_dimension_numbers<[1], [0], [0], [1], [0, 0, 1, 1], [], []>} : vector<3x12xf32>, vector<12x8xf32>, vector<3x8xf32> -> vector<3x8xf32>
    %8 = vector.shape_cast %7 : vector<3x8xf32> to vector<1x3x8xf32>
    %c0_7 = arith.constant 0 : index
    %c0_8 = arith.constant 0 : index
    %9 = vector.load %arg4[%c0_7, %c0_8] : memref<2x8xf32, #tpu.memory_space<vmem>>, vector<2x8xf32>
    %10 = vector.shape_cast %9 : vector<2x8xf32> to vector<2x1x8xf32>
    %11 = vector.broadcast %8 : vector<1x3x8xf32> to vector<2x3x8xf32>
    %12 = vector.broadcast %10 : vector<2x1x8xf32> to vector<2x3x8xf32>
    %13 = arith.addf %11, %12 : vector<2x3x8xf32>
    %cst_9 = arith.constant dense<0x7F800000> : vector<2x3xf32>
    %14 = vector.multi_reduction <minimumf>, %13, %cst_9 [2] : vector<2x3x8xf32> to vector<2x3xf32>
    %15 = math.sqrt %14 : vector<2x3xf32>
    %cst_10 = arith.constant 9.99999974E-5 : f32
    %16 = vector.broadcast %cst_10 : f32 to vector<2x3xf32>
    %17 = arith.addf %15, %16 : vector<2x3xf32>
    %cst_11 = arith.constant 1.000000e+00 : f32
    %18 = vector.broadcast %cst_11 : f32 to vector<2x3xf32>
    %19 = arith.divf %18, %17 : vector<2x3xf32>
    %cst_12 = arith.constant 5.000000e-01 : f32
    %20 = vector.broadcast %cst_12 : f32 to vector<2x3xf32>
    %21 = arith.addf %20, %19 : vector<2x3xf32>
    %c0_13 = arith.constant 0 : index
    %c0_14 = arith.constant 0 : index
    %22 = vector.load %arg5[%c0_13, %c0_14] : memref<2x6xf32, #tpu.memory_space<vmem>>, vector<2x3xf32>
    tpu.vector_store %arg5[%c0_13, %c0_14], %21 {strides = array<i32>} : memref<2x6xf32, #tpu.memory_space<vmem>>, vector<2x3xf32>,
    %23 = vector.extract_strided_slice %21 {offsets = [0, 2], sizes = [2, 1], strides = [1, 1]} : vector<2x3xf32> to vector<2x1xf32>
    %24 = vector.shape_cast %23 : vector<2x1xf32> to vector<2x1xf32>
    %25 = vector.broadcast %24 : vector<2x1xf32> to vector<2x3xf32>
    %c0_15 = arith.constant 0 : index
    %c3 = arith.constant 3 : index
    %26 = vector.load %arg5[%c0_15, %c3] : memref<2x6xf32, #tpu.memory_space<vmem>>, vector<2x3xf32>
    tpu.vector_store %arg5[%c0_15, %c3], %25 {strides = array<i32>} : memref<2x6xf32, #tpu.memory_space<vmem>>, vector<2x3xf32>,
    return
  }
  func.func @transform_0(%arg0: i32) -> (i32, i32) {
    %c0_i32 = arith.constant 0 : i32
    %c0_i32_0 = arith.constant 0 : i32
    %c0_i32_1 = arith.constant 0 : i32
    return %c0_i32, %c0_i32_0 : i32, i32
  }
  func.func @transform_1(%arg0: i32) -> (i32, i32) {
    %c0_i32 = arith.constant 0 : i32
    %c0_i32_0 = arith.constant 0 : i32
    %c0_i32_1 = arith.constant 0 : i32
    return %c0_i32, %c0_i32_0 : i32, i32
  }
  func.func @transform_2(%arg0: i32) -> (i32, i32) {
    %c0_i32 = arith.constant 0 : i32
    %c0_i32_0 = arith.constant 0 : i32
    %c0_i32_1 = arith.constant 0 : i32
    return %c0_i32, %c0_i32_0 : i32, i32
  }
  func.func @transform_3(%arg0: i32) -> (i32, i32) {
    %c0_i32 = arith.constant 0 : i32
    %c0_i32_0 = arith.constant 0 : i32
    %c0_i32_1 = arith.constant 0 : i32
    return %c0_i32, %c0_i32_0 : i32, i32
  }
  func.func @transform_4(%arg0: i32) -> (i32, i32) {
    %c0_i32 = arith.constant 0 : i32
    %c0_i32_0 = arith.constant 0 : i32
    %c0_i32_1 = arith.constant 0 : i32
    return %c0_i32, %c0_i32_0 : i32, i32
  }
}

</mosaic_0001>

<bundles_post_ra>
// kernel: tpu_custom_call.1
= control target key start
LH: loop header
LB: loop body
LE: loop exit
PB: predicated region body
PF: predicated region fallthrough
CT: control target
= control target key end

     0   :  { %vm31_vm0 = vcmask 1041408   ;;  %vm376_vm1 = vmmov 1   ;;  %vm24_vm3 = vcmask 80896   ;;  %s439_s0 = inlined_call_operand.vmem [shape: f32[12,10], index: 0, kind: input, shape index: {}]   ;;  %s440_s1 = inlined_call_operand.vmem [shape: f32[10,8], index: 1, kind: input, shape index: {}]   ;;  %s441_s2 = inlined_call_operand.vmem [shape: f32[3,12], index: 2, kind: input, shape index: {}]   ;;  %s442_s3 = inlined_call_operand.vmem [shape: f32[2,8], index: 3, kind: input, shape index: {}]   ;;  %s443_s4 = inlined_call_operand.hbm [shape: f32[2,6], index: 4, kind: output, shape index: {}]  }
   0x1   :  { %v22_v0 = vld [vmem:[%s440_s1] sm:$0xff]  ;;  %v23_v1 = vld [vmem:[%s440_s1 + $0x8] sm:$0x3]  ;;  %vm329_vm2 = vmpackc.low %vm31_vm0, %vm376_vm1 }
   0x2   :  { %v18_v2 = vld [vmem:[%s439_s0] sm:$0xff]  ;;  %v328_v3 = vpack.c.bf16 %v23_v1, %v22_v0  ;;  %v19_v5 = vld [vmem:[%s439_s0 + $0x8] sm:$0xf] }
   0x3   :  { %v20_v4 = vmul.f32 0.001, %v18_v2 }
   0x4   :  { %9 = vsyncpa [#allocation3], 0  ;;  %330 = vmatprep.subr.msk.bf16.mxu0 %vm329_vm2, %v328_v3  ;;  %v21_v6 = vmul.f32 0.001, %v19_v5  ;;  %v377_v7 = vmov 0.0|0.0   ;;  %vm378_vm4 = vmmov 0   ;;  %v204_v17 = vlaneseq }
   0x5   :  { %318 = vmatprep.mubr.msk.f32.mxu0 %vm24_vm3, %v20_v4  ;;  %333 = vmatpush3.bf16.msk.msra.mxu0 %vm329_vm2, %v328_v3  ;;  %v379_v8 = vmov 0.0   ;;  %vm117_vm5 = vcmask 1043456   ;;  %v110_v14 = vld [vmem:[%s441_s2] sm:$0x7]  ;;  %vm113_vm7 = vcmask 97280   ;;  %vm227_vm8 = vcmask 59392  }
   0x6   :  { %334 = vmatprep.subr.bf16.mxu1 %v377_v7  ;;  %325 = vmatprep.mubr.msk.f32.mxu1 %vm378_vm4, %v379_v8  ;;  %vm336_vm6 = vmpackc.low %vm117_vm5, %vm376_vm1  ;;  %v380_v15 = vmov 1966171168   ;;  %v205_v19 = vshrl.u32 %v204_v17, 7  ;;  %v259_v48 = vand.u32 127, %v204_v17  ;;  %vm268_vm13 = vcmask 1041409   ;;  %s381_s2 = smov [#allocation2]  }
   0x7   :  { %v202_v16 = vunpack.c.l.s4 %v380_v15  ;;  %v306_v20 = vld.sshfl [vmem:[%s442_s3] sm:$0x11 pattern:$0x75316420]  ;;  %vm271_vm14 = vcmask 17408   ;;  %s293_s3 = sshll.u32 %s381_s2, 4  ;;  %s294_s3 = int_to_ptr.vmem [resolvable:$true] %s293_s3 }
   0x8   :  { %319 = vmatmul.mubr.msk.f32.vlgmr.msra.gmra.mrb[0].mxu0 %vm24_vm3, %v21_v6  ;;  %v200_v22 = vcombine.high %v306_v20, %v306_v20  ;;  %v217_v23 = vsub.s32 0, %v205_v19  ;;  %v262_v51 = vsub.s32 %v259_v48, %v205_v19  ;;  %v275_v52 = vsub.s32 2, %v205_v19  ;;  %s352_s25 = scalar_lea.vmem %s294_s3, 32  ;;  %p357_p1 = scmp.lt.s32.totalorder %s294_s3, %s294_s3 }
   0x9   :  { %v203_v18 = vunpack.c.0.s8 %v202_v16  ;;  %vm285_vm15 = vcmask 42008   ;;  %p353_p0 = scmp.ne.s32.totalorder %s294_s3, %s352_s25  ;;  %p358_p2 = scmp.lt.s32.totalorder %s352_s25, %s352_s25 }
   0xb   :  { %v206_v21 = vsub.s32 %v203_v18, %v205_v19  ;;  %p359_p3 = por %p358_p2, %p357_p1 }
   0xd   :  { %v207_v24 = vrot.slane %v306_v20, %v206_v21  ;;  %v214_v25 = vrot.slane %v200_v22, %v206_v21  ;;  %p360_p4 = pnand %p359_p3, %p353_p0 }
   0xf   :  { %v218_v26 = vrot.slane %v207_v24, %v217_v23  ;;  %v222_v27 = vrot.slane %v214_v25, %v217_v23 }
  0xdb   :  { %v320_v9 = vpop.f32.mrb[0].mxu0 }
  0xdc   :  { %v112_v10 = vmul.f32 %v320_v9, %v320_v9  ;;  %v101_v11 = vpop.f32.mrb[1].mxu0 }
  0xdd   :  { %v111_v12 = vmul.f32 %v101_v11, %v101_v11 }
  0xdf   :  { %v335_v13 = vpack.c.bf16 %v112_v10, %v111_v12 }
  0xe1   :  { %337 = vmatpush3.bf16.msk.msra.mxu1 %vm336_vm6, %v335_v13 }
  0xe4   :  { %326 = vmatmul.mubr.msk.f32.vlgmr.msra.gmra.mrb[0].mxu1 %vm113_vm7, %v110_v14 }
 0x1b7   :  { %v187_v28 = vpop.f32.mrb[0].mxu1 }
 0x1b8   :  { %v327_v29 = vpop.f32.mrb[1].mxu1  ;;  %v225_v30 = vadd.f32 %v218_v26, %v187_v28  ;;  %v226_v31 = vadd.f32 %v222_v27, %v187_v28 }
 0x1ba   :  { %v228_v32 = vsel %vm227_vm8, %v225_v30, inf  ;;  %v231_v33 = vsel %vm227_vm8, %v226_v31, inf }
 0x1bb   :  { %229 = vmin.xlane.f32.xlu0 %v228_v32 }
 0x1bf   :  { %232 = vmin.xlane.f32.xlu0 %v231_v33 }
 0x248   :  { %v230_v34 = vpop.xlane.xlu0 %229 }
 0x249   :  { %344 = vrsqrt.f32 %v230_v34  ;;  %vm236_vm9 = vcmp.eq.f32.partialorder %v230_v34, inf  ;;  %v239_v38 = vand.u32 2147483648, %v230_v34  ;;  %vm238_vm10 = vcmp.eq.f32.partialorder %v230_v34, 0.0 }
 0x24c   :  { %v233_v35 = vpop.xlane.xlu0 %232 }
 0x24d   :  { %346 = vrsqrt.f32 %v233_v35  ;;  %vm243_vm11 = vcmp.eq.f32.partialorder %v233_v35, inf  ;;  %v246_v44 = vand.u32 2147483648, %v233_v35  ;;  %vm245_vm12 = vcmp.eq.f32.partialorder %v233_v35, 0.0 }
 0x253   :  { %v345_v36 = vpop.eup %344 }
 0x254   :  { %v235_v37 = vmul.f32 %v345_v36, %v230_v34 }
 0x256   :  { %v237_v39 = vsel %vm236_vm9, %v230_v34, %v235_v37 }
 0x257   :  { %v347_v40 = vpop.eup %346  ;;  %v240_v41 = vsel %vm238_vm10, %v239_v38, %v237_v39 }
 0x258   :  { %v242_v42 = vmul.f32 %v347_v40, %v233_v35  ;;  %v248_v43 = vadd.f32 0.0001, %v240_v41 }
 0x25a   :  { %v244_v45 = vsel %vm243_vm11, %v233_v35, %v242_v42  ;;  %348 = vrcp.f32 %v248_v43 }
 0x25b   :  { %v247_v46 = vsel %vm245_vm12, %v246_v44, %v244_v45 }
 0x25c   :  { %v249_v47 = vadd.f32 0.0001, %v247_v46 }
 0x25e   :  { %350 = vrcp.f32 %v249_v47 }
 0x264   :  { %v349_v49 = vpop.eup %348 }
 0x265   :  { %v254_v50 = vadd.f32 0.5, %v349_v49 }
 0x267   :  { %v263_v55 = vrot.slane %v254_v50, %v262_v51  ;;  %v276_v57 = vrot.slane %v254_v50, %v275_v52 }
 0x268   :  { %v351_v53 = vpop.eup %350 }
 0x269   :  { %v255_v54 = vadd.f32 0.5, %v351_v53 }
 0x26b   :  { %v267_v56 = vrot.slane %v255_v54, %v262_v51  ;;  %v280_v58 = vrot.slane %v255_v54, %v275_v52 }
 0x26d   :  { %v269_v59 = vsel %vm268_vm13, %v267_v56, %v263_v55  ;;  %v283_v60 = vsel %vm268_vm13, %v280_v58, %v276_v57 }
 0x26e   :  { %272 = vst.msk [vmem:[#allocation2] sm:$0x3] %vm271_vm14, %v269_v59 }
 0x26f   :  { %286 = vst.msk [vmem:[#allocation2] sm:$0x3] %vm285_vm15, %v283_v60 }
 0x270   :  { %363 = shalt.err (!%p360_p4)
}
 0x271   :  { %s364_s28 = scalar_lea.hbm %s443_s4, 32 }
 0x272   :  { %p365_p5 = scmp.ne.s32.totalorder %s443_s4, %s364_s28  ;;  %p368_p6 = scmp.lt.u32.totalorder %s364_s28, %s443_s4 }
 0x274   :  { %p370_p7 = pnand %p368_p6, %p365_p5 }
 0x276   :  { %373 = shalt.err (!%p370_p7)
}
 0x277   :  { %296 = dma.vmem_to_hbm [thread:$0]  %s294_s3, 32, %s443_s4, [#allocation3]  }
 0x278   :  { %374 = dma.done.wait [#allocation3], 32  }
 0x279   :  { %375 = vsyncadd [#allocation3], 4294967264 }
 0x27a   :  { %300 = vsyncpa [#allocation3], 1 }

</bundles_post_ra>
